<compile_context>
chip_gen: v5e
topology: v5e:2x2
jax: 0.10.0
libtpu: 0.0.40
codegen_flags: <defaults>
</compile_context>

<pallas_src>
import jax
import jax.numpy as jnp
from jax import lax
from jax.experimental import pallas as pl
from jax.experimental.pallas import tpu as pltpu


def _round_up(n, m):
    return ((n + m - 1) // m) * m


def _choose_tile_l(L):
    """Pick a lane-aligned token tile; prefer exact divisors (no partial edge)."""
    if L <= 1024:
        return L  # whole axis is already a single modest tile
    for tl in (1024, 896, 768, 640, 512, 384, 256, 128):
        if L % tl == 0:
            return tl
    # No clean divisor: 512-wide tiles with a masked partial last block.
    return 512


def _make_norm_kernel(c_true, eps, need_mask):
    """flatten(2).transpose(1,2) + LayerNorm(embed_dim) on one (C_out, TL) tile."""

    def kernel(x_ref, gamma_ref, beta_ref, o_ref):
        # x_ref:     (1, C_out, TL)
        # gamma_ref: (1, C_out)   (zeros in padded lanes)
        # beta_ref:  (1, C_out)   (zeros in padded lanes)
        # o_ref:     (1, TL, C_out)
        xt = x_ref[0].T                       # transpose in the input dtype (bf16-friendly)
        xf = xt.astype(jnp.float32)           # (TL, C_out) f32 for the stats/normalize math
        inv_c = jnp.float32(1.0 / c_true)

        # Padded input channels are exact zeros, so an unmasked sum / true-C is
        # the correct mean even on the padded width.
        mean = jnp.sum(xf, axis=-1, keepdims=True) * inv_c
        centered = xf - mean                  # computed once, reused for var and y
        if need_mask:
            # Exclude padded lanes (where centered == -mean) from the variance
            # and force their output contribution to exactly zero.
            lane = lax.broadcasted_iota(jnp.int32, centered.shape, 1)
            centered = jnp.where(lane < c_true, centered, 0.0)
        var = jnp.sum(centered * centered, axis=-1, keepdims=True) * inv_c
        y = centered * lax.rsqrt(var + eps)
        y = y * gamma_ref[...].astype(jnp.float32) + beta_ref[...].astype(jnp.float32)
        o_ref[0] = y.astype(o_ref.dtype)      # full-width, lane-dense store

    return kernel


def _transpose_kernel(x_ref, o_ref):
    # norm_layer is None: pure flatten + transpose (padded channels are zeros).
    # NOTE: XLA's native transpose already runs at the HBM roofline; this path
    # only earns its keep if fused with a consumer.  Kept for API parity.
    o_ref[0] = x_ref[0].T.astype(o_ref.dtype)


def patch_embed_forward(x, gamma=None, beta=None, *, eps=1e-5,
                        pad_lanes=True, tile_l=None):
    """x: (B, C, H, W). Returns (B, H*W, C). LayerNorm applied iff gamma/beta given."""
    B, C, H, W = x.shape
    L = H * W
    x_flat = x.reshape(B, C, L)  # glue reshape, no compute

    # Lane-dense output: pad embed_dim to a multiple of 128 so output stores
    # are unmasked full-lane vst (biggest measured lever for mem-bound kernels).
    C_out = _round_up(C, 128) if (pad_lanes and C % 128 != 0) else C
    if C_out != C:
        x_flat = jnp.pad(x_flat, ((0, 0), (0, C_out - C), (0, 0)))

    TL = tile_l if tile_l is not None else _choose_tile_l(L)
    n_l = pl.cdiv(L, TL)

    in_spec = pl.BlockSpec((1, C_out, TL), lambda b, l: (b, 0, l))
    out_spec = pl.BlockSpec((1, TL, C_out), lambda b, l: (b, l, 0))
    out_shape = jax.ShapeDtypeStruct((B, L, C_out), x.dtype)

    # Explicit VMEM budget: double-buffered in/out blocks + f32 temporaries,
    # 2x headroom, clamped to a range safe on every generation (v5e..v7x).
    itemsize = jnp.dtype(x.dtype).itemsize
    in_block = C_out * TL * itemsize
    out_block = TL * C_out * itemsize
    f32_tmps = 4 * TL * C_out * 4
    need = 2 * in_block + 2 * out_block + f32_tmps
    vmem_limit = int(min(max(2 * need, 16 << 20), 32 << 20))

    cparams = pltpu.CompilerParams(
        dimension_semantics=("parallel", "parallel"),  # B and L both shardable (v7x 2 TCs)
        vmem_limit_bytes=vmem_limit,
    )

    if gamma is None:
        out = pl.pallas_call(
            _transpose_kernel,
            out_shape=out_shape,
            grid_spec=pltpu.PrefetchScalarGridSpec(
                num_scalar_prefetch=0,
                grid=(B, n_l),
                in_specs=[in_spec],
                out_specs=out_spec,
            ),
            compiler_params=cparams,
        )(x_flat)
    else:
        if C_out != C:
            gamma2 = jnp.pad(gamma.reshape(1, C), ((0, 0), (0, C_out - C)))
            beta2 = jnp.pad(beta.reshape(1, C), ((0, 0), (0, C_out - C)))
        else:
            gamma2 = gamma.reshape(1, C)
            beta2 = beta.reshape(1, C)
        kernel = _make_norm_kernel(C, eps, need_mask=(C_out != C))
        out = pl.pallas_call(
            kernel,
            out_shape=out_shape,
            grid_spec=pltpu.PrefetchScalarGridSpec(
                num_scalar_prefetch=0,
                grid=(B, n_l),
                in_specs=[
                    in_spec,
                    pl.BlockSpec((1, C_out), lambda b, l: (0, 0)),
                    pl.BlockSpec((1, C_out), lambda b, l: (0, 0)),
                ],
                out_specs=out_spec,
            ),
            compiler_params=cparams,
        )(x_flat, gamma2, beta2)

    if C_out != C:
        out = out[:, :, :C]  # trim lane padding (fuses with consumer in practice)
    return out


if __name__ == "__main__":
    # Module config: img_size=16, patch_size=4 -> patches_resolution=(4,4), L=16
    # embed_dim=32, norm_layer=LayerNorm (gamma=1, beta=0: PyTorch default init).
    B, embed_dim, Hp, Wp = 2, 32, 4, 4

    key = jax.random.PRNGKey(0)
    x = jax.random.normal(key, (B, embed_dim, Hp, Wp), dtype=jnp.float32)

    gamma = jnp.ones((embed_dim,), dtype=jnp.float32)
    beta = jnp.zeros((embed_dim,), dtype=jnp.float32)

    out = patch_embed_forward(x, gamma, beta)
    out = jax.block_until_ready(out)

    # Pure-JAX reference (flatten(2).transpose(1,2) + LayerNorm over embed_dim).
    ref = jnp.transpose(x.reshape(B, embed_dim, Hp * Wp), (0, 2, 1))
    mean = jnp.mean(ref, axis=-1, keepdims=True)
    var = jnp.mean((ref - mean) ** 2, axis=-1, keepdims=True)
    ref = (ref - mean) / jnp.sqrt(var + 1e-5) * gamma + beta
    assert out.shape == (B, Hp * Wp, embed_dim)
    assert jnp.max(jnp.abs(out - ref)) < 1e-5

    # norm_layer=None path (pure flatten+transpose): must be exact.
    out_nonorm = jax.block_until_ready(patch_embed_forward(x))
    ref_nonorm = jnp.transpose(x.reshape(B, embed_dim, Hp * Wp), (0, 2, 1))
    assert out_nonorm.shape == (B, Hp * Wp, embed_dim)
    assert jnp.max(jnp.abs(out_nonorm - ref_nonorm)) == 0

    print("KERNEL_OK")
</pallas_src>

<mosaic_0001>
module attributes {stable_mosaic.version = 11 : i64} {
  func.func @kernel(%arg0: i32, %arg1: i32, %arg2: memref<1x128x16xf32, #tpu.memory_space<vmem>>, %arg3: memref<1x128xf32, #tpu.memory_space<vmem>>, %arg4: memref<1x128xf32, #tpu.memory_space<vmem>>, %arg5: memref<1x16x128xf32, #tpu.memory_space<vmem>>) attributes {dimension_semantics = [#tpu.dimension_semantics<parallel>, #tpu.dimension_semantics<parallel>], iteration_bounds = array<i64: 2, 1>, scalar_prefetch = 0 : i64, scratch_operands = 0 : i64, tpu.core_type = #tpu.core_type<tc>, window_params = [{transform_indices = @transform_0, window_bounds = array<i64: 1, 128, 16>}, {pipeline_mode = #tpu.pipeline_mode<synchronous>, transform_indices = @transform_1, window_bounds = array<i64: 1, 128>}, {pipeline_mode = #tpu.pipeline_mode<synchronous>, transform_indices = @transform_2, window_bounds = array<i64: 1, 128>}, {transform_indices = @transform_3, window_bounds = array<i64: 1, 16, 128>}]} {
    %c0 = arith.constant 0 : index
    %c0_0 = arith.constant 0 : index
    %c0_1 = arith.constant 0 : index
    %0 = vector.load %arg2[%c0, %c0_0, %c0_1] : memref<1x128x16xf32, #tpu.memory_space<vmem>>, vector<1x128x16xf32>
    %1 = vector.shape_cast %0 : vector<1x128x16xf32> to vector<128x16xf32>
    %2 = tpu.transpose %1, [1, 0] : vector<128x16xf32> -> vector<16x128xf32>
    %cst = arith.constant dense<0.000000e+00> : vector<16xf32>
    %3 = vector.multi_reduction <add>, %2, %cst [1] : vector<16x128xf32> to vector<16xf32>
    %4 = vector.shape_cast %3 : vector<16xf32> to vector<16x1xf32>
    %cst_2 = arith.constant 3.125000e-02 : f32
    %5 = vector.broadcast %cst_2 : f32 to vector<16x1xf32>
    %6 = arith.mulf %4, %5 : vector<16x1xf32>
    %7 = vector.broadcast %6 : vector<16x1xf32> to vector<16x128xf32>
    %8 = arith.subf %2, %7 : vector<16x128xf32>
    %9 = tpu.iota {dimensions = array<i32: 1>} : vector<16x128xi32>
    %c32_i32 = arith.constant 32 : i32
    %10 = vector.broadcast %c32_i32 : i32 to vector<16x128xi32>
    %11 = arith.cmpi slt, %9, %10 : vector<16x128xi32>
    %cst_3 = arith.constant 0.000000e+00 : f32
    %12 = vector.broadcast %cst_3 : f32 to vector<16x128xf32>
    %13 = arith.select %11, %8, %12 : vector<16x128xi1>, vector<16x128xf32>
    %14 = arith.mulf %13, %13 : vector<16x128xf32>
    %cst_4 = arith.constant dense<0.000000e+00> : vector<16xf32>
    %15 = vector.multi_reduction <add>, %14, %cst_4 [1] : vector<16x128xf32> to vector<16xf32>
    %16 = vector.shape_cast %15 : vector<16xf32> to vector<16x1xf32>
    %cst_5 = arith.constant 3.125000e-02 : f32
    %17 = vector.broadcast %cst_5 : f32 to vector<16x1xf32>
    %18 = arith.mulf %16, %17 : vector<16x1xf32>
    %cst_6 = arith.constant 9.99999974E-6 : f32
    %19 = vector.broadcast %cst_6 : f32 to vector<16x1xf32>
    %20 = arith.addf %18, %19 : vector<16x1xf32>
    %21 = math.rsqrt %20 : vector<16x1xf32>
    %22 = vector.broadcast %21 : vector<16x1xf32> to vector<16x128xf32>
    %23 = arith.mulf %13, %22 : vector<16x128xf32>
    %c0_7 = arith.constant 0 : index
    %c0_8 = arith.constant 0 : index
    %24 = vector.load %arg3[%c0_7, %c0_8] : memref<1x128xf32, #tpu.memory_space<vmem>>, vector<1x128xf32>
    %25 = vector.broadcast %24 : vector<1x128xf32> to vector<16x128xf32>
    %26 = arith.mulf %23, %25 : vector<16x128xf32>
    %c0_9 = arith.constant 0 : index
    %c0_10 = arith.constant 0 : index
    %27 = vector.load %arg4[%c0_9, %c0_10] : memref<1x128xf32, #tpu.memory_space<vmem>>, vector<1x128xf32>
    %28 = vector.broadcast %27 : vector<1x128xf32> to vector<16x128xf32>
    %29 = arith.addf %26, %28 : vector<16x128xf32>
    %c0_11 = arith.constant 0 : index
    %c0_12 = arith.constant 0 : index
    %c0_13 = arith.constant 0 : index
    %30 = vector.load %arg5[%c0_11, %c0_12, %c0_13] : memref<1x16x128xf32, #tpu.memory_space<vmem>>, vector<1x16x128xf32>
    %31 = vector.shape_cast %30 : vector<1x16x128xf32> to vector<16x128xf32>
    %32 = vector.shape_cast %29 : vector<16x128xf32> to vector<1x16x128xf32>
    tpu.vector_store %arg5[%c0_11, %c0_12, %c0_13], %32 {strides = array<i32>} : memref<1x16x128xf32, #tpu.memory_space<vmem>>, vector<1x16x128xf32>,
    return
  }
  func.func @transform_0(%arg0: i32, %arg1: i32) -> (i32, i32, i32) {
    %c0_i32 = arith.constant 0 : i32
    %c0_i32_0 = arith.constant 0 : i32
    return %arg0, %c0_i32, %arg1 : i32, i32, i32
  }
  func.func @transform_1(%arg0: i32, %arg1: i32) -> (i32, i32) {
    %c0_i32 = arith.constant 0 : i32
    %c0_i32_0 = arith.constant 0 : i32
    %c0_i32_1 = arith.constant 0 : i32
    return %c0_i32, %c0_i32_0 : i32, i32
  }
  func.func @transform_2(%arg0: i32, %arg1: i32) -> (i32, i32) {
    %c0_i32 = arith.constant 0 : i32
    %c0_i32_0 = arith.constant 0 : i32
    %c0_i32_1 = arith.constant 0 : i32
    return %c0_i32, %c0_i32_0 : i32, i32
  }
  func.func @transform_3(%arg0: i32, %arg1: i32) -> (i32, i32, i32) {
    %c0_i32 = arith.constant 0 : i32
    %c0_i32_0 = arith.constant 0 : i32
    return %arg0, %arg1, %c0_i32 : i32, i32, i32
  }
}

</mosaic_0001>

<bundles_post_ra>
// kernel: tpu_custom_call.1
= control target key start
LH: loop header
LB: loop body
LE: loop exit
PB: predicated region body
PF: predicated region fallthrough
CT: control target
= control target key end

     0   :  { %8 = vsyncpa [#allocation3], 0  ;;  %s700_s0 = inlined_call_operand.vmem [shape: f32[2,128,16], index: 0, kind: input, shape index: {}]   ;;  %s701_s1 = inlined_call_operand.vmem [shape: f32[1,128], index: 1, kind: input, shape index: {}]   ;;  %s702_s2 = inlined_call_operand.vmem [shape: f32[1,128], index: 2, kind: input, shape index: {}]   ;;  %s703_s3 = inlined_call_operand.hbm [shape: f32[2,16,128], index: 3, kind: output, shape index: {}]  }
   0x1   :  { %10 = vsyncpa [#allocation3 + $0x1], 0  ;;  %s579_s12 = smov 0   ;;  %s581_s13 = smov 0  }
   0x2   :  { %s583_s14 = smov 0   ;;  %s585_s15 = smov 0  }
   0x3   :  { %s587_s16 = smov 0   ;;  %s589_s17 = smov 0  }
   0x4 LB: > { %s399_s18 = sadd.s32 4294967295, %s555_s17   ;;  %s400_s19 = sadd.s32 4294967294, %s555_s17   ;;  %s555_s17 = sphi %s589_s17, %s16_s17   ;;  %s551_s16 = sphi %s587_s16, %s710_s16   ;;  %s547_s15 = sphi %s585_s15, %s709_s15   ;;  %s543_s14 = sphi %s583_s14, %s708_s14   ;;  %s539_s13 = sphi %s581_s13, %s707_s13   ;;  %s535_s12 = sphi %s579_s12, %s706_s12  }
   0x5   : > { %s28_s20 = sadd.s32 1, %s551_s16  ;;  %s107_s21 = sadd.s32 1, %s543_s14 }
   0x6   : > { %p30_p0 = scmp.ge.s32.totalorder %s28_s20, 2  ;;  %p117_p1 = scmp.ne.s32.totalorder %s543_s14, %s539_s13 }
   0x7   : > { %p118_p2 = scmp.eq.s32.totalorder %s399_s18, 1  ;;  %p123_p3 = scmp.ne.s32.totalorder %s539_s13, %s535_s12 }
   0x8   : > { %s712_s20 = smov (%p30_p0, %s28_s20), 0  ;;  %p124_p5 = scmp.eq.s32.totalorder %s400_s19, 1 }
   0x9   : > { %p619_p4 = por %p118_p2, %p117_p1  ;;  %s102_s23 = ssub.s32 %s551_s16, %s712_s20 }
   0xa   : > { %p403_p6 = scmp.ge.s32.totalorder %s555_s17, 1  ;;  %p105_p7 = scmp.eq.s32.totalorder %s102_s23, 0 }
   0xb   : > { %p626_p8 = por %p124_p5, %p123_p3  ;;  %p159_p9 = scmp.lt.s32.totalorder %s555_s17, 3 }
   0xc   : > { %s632_s25 = scalar_select %p105_p7, %s543_s14, %s107_s21  }
   0xd   : > { %p160_p10 = pnand %p403_p6, %p159_p9 }
   0xe   : > { %p186_p11 = scmp.lt.s32.totalorder (!%p160_p10), %s547_s15, 1  ;;  %s183_s4 = sand.u32 (!%p160_p10), 1, %s539_s13  }
   0xf   : > { %163 = sbr.rel (%p160_p10) target bundleno = 469 (0x1d5), region = 32  ;;  %s404_s9 = sshll.u32 (!%p160_p10), %s183_s4, 4 }
  0x10   : > { %s413_s10 = sshll.u32 (!%p160_p10), %s547_s15, 4  ;;  %s185_s21 = scalar_lea.vmem (!%p160_p10), [#allocation2], %s404_s9 }
  0x11   : > { %s316_s19 = scalar_lea.hbm (!%p160_p10), %s703_s3, %s413_s10  ;;  %s317_s23 = sshll.u32 (!%p160_p10), %s185_s21, 4  ;;  %s318_s23 = int_to_ptr.vmem [resolvable:$true] %s317_s23 }
  0x12   : > { %s497_s5 = scalar_lea.hbm (!%p160_p10), %s703_s3, 32 }
  0x14   : > { %s187_s26 = scalar_select %p186_p11, %s547_s15, 1  ;;  %v251_v18 = vlaneseq  ;;  %v471_v44 = vld [vmem:[%s701_s1] ss:$0 sm:$0xff] }
  0x15   : > { %v472_v48 = vld [vmem:[%s702_s2] ss:$0 sm:$0xff]  ;;  %s303_s15 = scalar_lea.sflag [#allocation3], %s183_s4 }
  0x16   : > { %s412_s27 = sshll.u32 %s187_s26, 7  ;;  %v252_v19 = vand.u32 127, %v251_v18  ;;  %s319_s26 = sshll.u32 %s316_s19, 4  ;;  %s320_s26 = int_to_ptr.hbm [resolvable:$true] %s319_s26 }
  0x17   : > { %s639_s30 = scalar_lea.vmem %s700_s0, %s412_s27  ;;  %s491_s27 = sshra.s32 %s320_s26, 4  ;;  %s492_s27 = int_to_ptr.hbm [resolvable:$true] %s491_s27 }
  0x18   : > { %v195_v0 = vld [vmem:[%s639_s30] sm:$0xff]  ;;  %v196_v1 = vld [vmem:[%s639_s30 + $0x8] sm:$0xff]  ;;  %v197_v2 = vld [vmem:[%s639_s30 + $0x10] sm:$0xff]  ;;  %vm253_vm0 = vcmp.lt.s32.totalorder %v252_v19, 32  ;;  %s493_s28 = scalar_lea.hbm %s492_s27, 16  ;;  %p498_p1 = scmp.lt.s32.totalorder %s492_s27, %s703_s3 }
  0x19   : > { %211 = vxpose.xlu0.b32.start [1/16] (narrow) %v195_v0, 16  ;;  %v198_v3 = vld [vmem:[%s639_s30 + $0x18] sm:$0xff]  ;;  %v199_v4 = vld [vmem:[%s639_s30 + $0x20] sm:$0xff]  ;;  %v200_v5 = vld [vmem:[%s639_s30 + $0x28] sm:$0xff]  ;;  %p494_p12 = scmp.ne.s32.totalorder %s492_s27, %s493_s28  ;;  %p499_p2 = scmp.lt.s32.totalorder %s497_s5, %s493_s28 }
  0x1a   : > { %v201_v6 = vld [vmem:[%s639_s30 + $0x30] sm:$0xff]  ;;  %v202_v7 = vld [vmem:[%s639_s30 + $0x38] sm:$0xff]  ;;  %v203_v8 = vld [vmem:[%s639_s30 + $0x40] sm:$0xff] }
  0x1b   : > { %v204_v9 = vld [vmem:[%s639_s30 + $0x48] sm:$0xff]  ;;  %v205_v10 = vld [vmem:[%s639_s30 + $0x50] sm:$0xff]  ;;  %v206_v11 = vld [vmem:[%s639_s30 + $0x58] sm:$0xff]  ;;  %p495_p13 = pnand %p494_p12, %p619_p4  ;;  %p500_p3 = por %p499_p2, %p498_p1 }
  0x1c   : > { %v207_v12 = vld [vmem:[%s639_s30 + $0x60] sm:$0xff]  ;;  %v208_v13 = vld [vmem:[%s639_s30 + $0x68] sm:$0xff]  ;;  %v209_v14 = vld [vmem:[%s639_s30 + $0x70] sm:$0xff] }
  0x1d   : > { %v210_v15 = vld [vmem:[%s639_s30 + $0x78] sm:$0xff]  ;;  %p496_p0 = pneg %p495_p13 }
  0x1f   : > { %p501_p5 = pnand %p500_p3, %p496_p0 }
  0x21   : > { %212 = vxpose.xlu0.b32.cont [2/16] (narrow) %v196_v1, 16 }
  0x29   : > { %213 = vxpose.xlu0.b32.cont [3/16] (narrow) %v197_v2, 16 }
  0x31   : > { %214 = vxpose.xlu0.b32.cont [4/16] (narrow) %v198_v3, 16 }
  0x39   : > { %215 = vxpose.xlu0.b32.cont [5/16] (narrow) %v199_v4, 16 }
  0x41   : > { %216 = vxpose.xlu0.b32.cont [6/16] (narrow) %v200_v5, 16 }
  0x49   : > { %217 = vxpose.xlu0.b32.cont [7/16] (narrow) %v201_v6, 16 }
  0x51   : > { %218 = vxpose.xlu0.b32.cont [8/16] (narrow) %v202_v7, 16 }
  0x59   : > { %219 = vxpose.xlu0.b32.cont [9/16] (narrow) %v203_v8, 16 }
  0x61   : > { %220 = vxpose.xlu0.b32.cont [10/16] (narrow) %v204_v9, 16 }
  0x69   : > { %221 = vxpose.xlu0.b32.cont [11/16] (narrow) %v205_v10, 16 }
  0x71   : > { %222 = vxpose.xlu0.b32.cont [12/16] (narrow) %v206_v11, 16 }
  0x79   : > { %223 = vxpose.xlu0.b32.cont [13/16] (narrow) %v207_v12, 16 }
  0x81   : > { %224 = vxpose.xlu0.b32.cont [14/16] (narrow) %v208_v13, 16 }
  0x89   : > { %225 = vxpose.xlu0.b32.cont [15/16] (narrow) %v209_v14, 16 }
  0x91   : > { %226 = vxpose.xlu0.b32.end [16/16] (narrow) %v210_v15, 16 }
  0xbd   : > { %v227_v16 = vpop.trf.xlu0 }
  0xbe   : > { %243 = vadd.xlane.f32.xlu1 %v227_v16 }
  0xc5   : > { %v228_v17 = vpop.trf.xlu0 }
  0xc6   : > { %245 = vadd.xlane.f32.xlu1 %v228_v17 }
 0x131   : > { %v244_v20 = vpop.xlane.xlu1 %243 }
 0x132   : > { %v247_v21 = vmul.f32 0.03125, %v244_v20 }
 0x134   : > { %v249_v22 = vsub.f32 %v227_v16, %v247_v21 }
 0x136   : > { %v254_v23 = vsel %vm253_vm0, %v249_v22, 0.0 }
 0x137   : > { %v256_v24 = vmul.f32 %v254_v23, %v254_v23 }
 0x139   : > { %258 = vadd.xlane.f32.xlu2 %v256_v24  ;;  %v246_v25 = vpop.xlane.xlu1 %245 }
 0x13a   : > { %v248_v26 = vmul.f32 0.03125, %v246_v25 }
 0x13c   : > { %v250_v27 = vsub.f32 %v228_v17, %v248_v26 }
 0x13e   : > { %v255_v28 = vsel %vm253_vm0, %v250_v27, 0.0 }
 0x13f   : > { %v257_v29 = vmul.f32 %v255_v28, %v255_v28 }
 0x141   : > { %260 = vadd.xlane.f32.xlu2 %v257_v29 }
 0x1ac   : > { %v259_v30 = vpop.xlane.xlu2 %258 }
 0x1ad   : > { %v262_v31 = vmul.f32 0.03125, %v259_v30 }
 0x1af   : > { %v264_v32 = vadd.f32 1e-05, %v262_v31 }
 0x1b1   : > { %473 = vrsqrt.f32 %v264_v32  ;;  %vm272_vm2 = vweird.f32 %v264_v32 }
 0x1b4   : > { %v261_v33 = vpop.xlane.xlu2 %260 }
 0x1b5   : > { %v263_v34 = vmul.f32 0.03125, %v261_v33 }
 0x1b7   : > { %v474_v35 = vpop.eup %473  ;;  %v265_v36 = vadd.f32 1e-05, %v263_v34 }
 0x1b8   : > { %v267_v37 = vmul.f32 %v474_v35, %v264_v32  ;;  %vm273_vm1 = vweird.f32 %v474_v35 }
 0x1b9   : > { %475 = vrsqrt.f32 %v265_v36  ;;  %vm274_vm3 = vmor %vm272_vm2, %vm273_vm1  ;;  %vm282_vm5 = vweird.f32 %v265_v36 }
 0x1ba   : > { %v268_v38 = vmul.f32 %v474_v35, %v267_v37 }
 0x1bc   : > { %v269_v39 = vmul.f32 0.5, %v268_v38 }
 0x1be   : > { %v270_v40 = vsub.f32 1.5, %v269_v39 }
 0x1bf   : > { %v476_v41 = vpop.eup %475 }
 0x1c0   : > { %v271_v42 = vmul.f32 %v474_v35, %v270_v40  ;;  %v277_v43 = vmul.f32 %v476_v41, %v265_v36  ;;  %vm283_vm4 = vweird.f32 %v476_v41 }
 0x1c1   : > { %vm284_vm6 = vmor %vm282_vm5, %vm283_vm4 }
 0x1c2   : > { %v275_v45 = vsel %vm274_vm3, %v474_v35, %v271_v42  ;;  %v278_v46 = vmul.f32 %v476_v41, %v277_v43 }
 0x1c3   : > { %v286_v47 = vmul.f32 %v275_v45, %v254_v23 }
 0x1c4   : > { %v279_v49 = vmul.f32 0.5, %v278_v46 }
 0x1c5   : > { %v292_v50 = vmul.f32 %v471_v44, %v286_v47 }
 0x1c6   : > { %v280_v51 = vsub.f32 1.5, %v279_v49 }
 0x1c7   : > { %v298_v52 = vadd.f32 %v472_v48, %v292_v50 }
 0x1c8   : > { %v281_v53 = vmul.f32 %v476_v41, %v280_v51 }
 0x1c9   : > { %300 = vst [vmem:[%s185_s21] sm:$0xff] %v298_v52 }
 0x1ca   : > { %v285_v54 = vsel %vm284_vm6, %v476_v41, %v281_v53 }
 0x1cb   : > { %v287_v55 = vmul.f32 %v285_v54, %v255_v28 }
 0x1cd   : > { %v293_v56 = vmul.f32 %v471_v44, %v287_v55 }
 0x1cf   : > { %v299_v57 = vadd.f32 %v472_v48, %v293_v56 }
 0x1d1   : > { %301 = vst [vmem:[%s185_s21 + $0x8] sm:$0xff] %v299_v57 }
 0x1d2   : > { %504 = shalt.err (!%p501_p5)
}
 0x1d3   : > { %s557_s4 = smov 128   ;;  %s558_s8 = smov 8  }
 0x1d4   : > { %414 = dma.vmem_to_hbm [thread:$0]  (%p619_p4), %s318_s23, 256, %s320_s26, %s303_s15, %s557_s4, %s557_s4, %s558_s8  }
 0x1d5 PF: > { %p420_p6 = scmp.ge.s32.totalorder %s555_s17, 2  ;;  %s334_s9 = sand.u32 1, %s535_s12  }
 0x1d6   : > { %s335_s10 = scalar_lea.sflag [#allocation3], %s334_s9 }
 0x1d7   : > { %p417_p7 = pnand %p420_p6, %p626_p8 }
 0x1d9   : > { %p418_p9 = pneg %p417_p7 }
 0x1db   : > { %530 = dma.done.wait (%p418_p9), %s335_s10, 256  }
 0x1dc   : > { %532 = vsyncadd (%p418_p9), %s335_s10, 4294967040  ;;  %s16_s17 = sadd.s32 1, %s555_s17   ;;  %s706_s12 = smov %s539_s13 }
 0x1dd   : > { %p13_p10 = scmp.ge.s32.totalorder %s16_s17, 4   ;;  %s707_s13 = smov %s543_s14 }
 0x1de   : > { %s708_s14 = smov %s632_s25  ;;  %s709_s15 = smov %s551_s16 }
 0x1df   : > { %s710_s16 = smov %s712_s20  ;;  %15 = sbr.rel (!%p13_p10) target bundleno = 4 (0x4), region = 67 }
 0x1e4   :  { %341 = vsyncpa [#allocation3], 1 }
 0x1e5   :  { %343 = vsyncpa [#allocation3 + $0x1], 1 }

</bundles_post_ra>
